<compile_context>
chip_gen: v7x
topology: tpu7x:2x2x1
jax: 0.10.0
libtpu: 0.0.40
codegen_flags: <defaults>
</compile_context>

<pallas_src>
import math
import functools

import numpy as np
import jax
import jax.numpy as jnp
from jax.experimental import pallas as pl
from jax.experimental.pallas import tpu as pltpu


# ------------------------------ tiling plan -------------------------------- #

_LANE_COLS = 512                          # row width: multiple of 128, rows are
                                          # contiguous in HBM -> contiguous DMA
_TARGET_BLOCK_ELEMS = 384 * _LANE_COLS    # ~768 KiB f32 per stream per block


def _plan(n):
    """Pick contiguous (block_rows, 512) row blocks, ~0.75 MiB per stream,
    and a grid of >= 2 whenever there is enough work (v7x dual-TC)."""
    grid = -(-n // _TARGET_BLOCK_ELEMS)                 # cdiv
    if grid < 2 and n >= 2 * 8 * _LANE_COLS:
        grid = 2                                        # span both TCs on v7x
    grid = max(1, grid)
    per_block = -(-n // grid)
    block_rows = -(-per_block // _LANE_COLS)
    block_rows = max(8, ((block_rows + 7) // 8) * 8)    # sublane multiple
    return block_rows, _LANE_COLS, grid


# ------------------------------ Pallas kernel ------------------------------ #

def _elementwise_kernel(da_ref, db_ref, t_ref, s_ref, loss_ref, w_ref, *, margin):
    # EqualizeGradNorm.apply is the identity in the forward pass.
    # TODO(synk): args.subloss / VideoSoftmax sources are not shipped with the
    # module; per-element MarginRank subloss and exp/running-normalizer softmax
    # are assumed.
    loss_ref[...] = jnp.maximum(
        0.0, -t_ref[...] * (da_ref[...] - db_ref[...]) + margin)
    # Fused VideoSoftmax weight:
    #   w = exp(x)/zx * exp(y)/zy * exp(z)/zz = exp(s),
    #   s = x + y + z - log(zx*zy*zz), pre-summed on the host in float64.
    w_ref[...] = jnp.exp(s_ref[...])


@functools.partial(jax.jit, static_argnames=("margin", "block_rows", "c", "grid"))
def _forward_device(da, db, tg, s, *, margin, block_rows, c, grid):
    """Pad to the block grid, run the elementwise Pallas kernel, slice back to
    the valid prefix — all inside one jit (single dispatch per forward)."""
    n = da.size
    rows = block_rows * grid
    padded = rows * c

    def prep(v):
        v = jnp.asarray(v, jnp.float32).reshape(-1)
        if padded > n:
            v = jnp.pad(v, (0, padded - n))             # pad <= one block
        return v.reshape(rows, c)

    spec = pl.BlockSpec((block_rows, c), lambda i: (i, 0))
    loss2d, w2d = pl.pallas_call(
        functools.partial(_elementwise_kernel, margin=float(margin)),
        out_shape=(jax.ShapeDtypeStruct((rows, c), jnp.float32),
                   jax.ShapeDtypeStruct((rows, c), jnp.float32)),
        grid=(grid,),
        in_specs=[spec] * 4,
        out_specs=(spec, spec),
        compiler_params=pltpu.CompilerParams(
            dimension_semantics=("parallel",)),
    )(prep(da), prep(db), prep(tg), prep(s))

    # Valid-prefix slice on device so the D2H fetch is exactly n elements.
    return loss2d.reshape(-1)[:n], w2d.reshape(-1)[:n]


# ------------------------------ host-side module ---------------------------- #

class ActorObserverLossPallas:
    """Forward-pass equivalent of models/layers/ActorObserverLoss.py."""

    def __init__(self, margin=0.5, decay=0.9, finaldecay=0.9):
        self.margin = float(margin)
        self.decay = float(decay)            # args.decay (VideoSoftmax storages)
        self.finaldecay = float(finaldecay)  # args.finaldecay (loss storage)
        self.xstorage = {}
        self.ystorage = {}
        self.zstorage = {}
        self.storage = {}

    # VideoSoftmax per-video running normalizer (host, string-keyed dict).
    def _video_softmax_normalizers(self, storage, vals_host, ids):
        for v, vid in zip(vals_host, ids):
            ev = math.exp(float(v))
            if vid not in storage:
                storage[vid] = ev
            else:
                storage[vid] = (1.0 - self.decay) * ev + self.decay * storage[vid]
        return np.array([storage[vid] for vid in ids], dtype=np.float64)

    # Per-video EMA of (loss, weight).
    # TODO(synk): sequential per-id EMA kept as a host loop (order matters when
    # a video id repeats within one batch); only one D2H round-trip is made.
    def _update_constants(self, loss_host, weights_host, ids):
        d = self.finaldecay
        for l, w, vid in zip(loss_host, weights_host, ids):
            if vid not in self.storage:
                self.storage[vid] = [float(l), float(w)]
            else:
                old_x, old_w = self.storage[vid]
                new_weight = (1.0 - d) * w + d * old_w
                val = ((1.0 - d) * w * l + d * old_w * old_x) / new_weight
                self.storage[vid] = [val, new_weight]
                if new_weight < 1e-4:
                    print("MILC new_weight is effectively 0")

    def _get_constants(self, ids):
        return np.array([self.storage[vid][0] for vid in ids], dtype=np.float64)

    def forward(self, dist_a, dist_b, x, y, z, target, ids):
        n = int(np.prod(np.asarray(dist_a).shape))
        block_rows, c, grid = _plan(n)

        # Stateful VideoSoftmax normalizers (host glue); one D2H fetch of x,y,z.
        xh, yh, zh = (np.asarray(v, dtype=np.float64).reshape(-1)
                      for v in jax.device_get((x, y, z)))
        zx = self._video_softmax_normalizers(self.xstorage, xh, ids)
        zy = self._video_softmax_normalizers(self.ystorage, yh, ids)
        zz = self._video_softmax_normalizers(self.zstorage, zh, ids)
        # Pre-summed softmax logit (float64 on host): kernel sees one stream.
        s = (xh + yh + zh - (np.log(zx) + np.log(zy) + np.log(zz))).astype(np.float32)

        # Hot path: per-element subloss + fused softmax weight (Pallas, 1 jit).
        loss_d, w_d = _forward_device(
            dist_a, dist_b, target, s,
            margin=self.margin, block_rows=block_rows, c=c, grid=grid)

        # Stateful EMA of (loss, w) per video id — one host round-trip of
        # exactly n elements each.
        loss_h, w_h = (np.asarray(v, np.float64)
                       for v in jax.device_get((loss_d, w_d)))
        self._update_constants(loss_h, w_h, ids)
        k = self._get_constants(ids)

        # Finalize on host in float64, matching the PyTorch reference exactly:
        #   nrm = (w.sum() + 1e-5) / N ;  final = ((loss - k) * (w / nrm)).sum()
        nrm = (w_h.sum() + 1e-5) / float(n)
        final = np.sum((loss_h - k) * (w_h / nrm))
        # (VERBOSE dprint logging of the reference is omitted — host prints only.)

        return jnp.asarray(final, jnp.float32), w_d


# ----------------------------------- main ----------------------------------- #

if __name__ == "__main__":
    N = 8  # batch of triplet distances / frame weights
    key = jax.random.PRNGKey(0)
    ka, kb, kx, ky, kz, kt = jax.random.split(key, 6)

    dist_a = jax.random.uniform(ka, (N,), jnp.float32, 0.0, 2.0)
    dist_b = jax.random.uniform(kb, (N,), jnp.float32, 0.0, 2.0)
    x = jax.random.normal(kx, (N,), jnp.float32) * 0.5
    y = jax.random.normal(ky, (N,), jnp.float32) * 0.5
    z = jax.random.normal(kz, (N,), jnp.float32) * 0.5
    target = jnp.where(jax.random.bernoulli(kt, 0.5, (N,)),
                       jnp.float32(1.0), jnp.float32(-1.0))
    ids = ["vid0", "vid0", "vid1", "vid1", "vid2", "vid2", "vid3", "vid3"]

    module = ActorObserverLossPallas(margin=0.5, decay=0.9, finaldecay=0.9)
    final, w = module.forward(dist_a, dist_b, x, y, z, target, ids)
    jax.block_until_ready((final, w))

    # Call a second time to exercise the stateful (running-storage) path.
    final2, w2 = module.forward(dist_a, dist_b, x, y, z, target, ids)
    jax.block_until_ready((final2, w2))

    assert final.shape == () and w.shape == (N,)
    assert np.isfinite(np.asarray(jax.device_get(final)))
    assert np.all(np.isfinite(np.asarray(jax.device_get(w))))
    print("KERNEL_OK")
</pallas_src>

<mosaic_0001>
module attributes {stable_mosaic.version = 11 : i64} {
  func.func @_elementwise_kernel(%arg0: i32, %arg1: memref<8x512xf32, #tpu.memory_space<vmem>>, %arg2: memref<8x512xf32, #tpu.memory_space<vmem>>, %arg3: memref<8x512xf32, #tpu.memory_space<vmem>>, %arg4: memref<8x512xf32, #tpu.memory_space<vmem>>, %arg5: memref<8x512xf32, #tpu.memory_space<vmem>>, %arg6: memref<8x512xf32, #tpu.memory_space<vmem>>) attributes {dimension_semantics = [#tpu.dimension_semantics<parallel>], iteration_bounds = array<i64: 1>, scalar_prefetch = 0 : i64, scratch_operands = 0 : i64, tpu.core_type = #tpu.core_type<tc>, window_params = [{transform_indices = @transform_0, window_bounds = array<i64: 8, 512>}, {transform_indices = @transform_1, window_bounds = array<i64: 8, 512>}, {transform_indices = @transform_2, window_bounds = array<i64: 8, 512>}, {transform_indices = @transform_3, window_bounds = array<i64: 8, 512>}, {transform_indices = @transform_4, window_bounds = array<i64: 8, 512>}, {transform_indices = @transform_5, window_bounds = array<i64: 8, 512>}]} {
    %c0 = arith.constant 0 : index
    %c0_0 = arith.constant 0 : index
    %0 = vector.load %arg3[%c0, %c0_0] : memref<8x512xf32, #tpu.memory_space<vmem>>, vector<8x512xf32>
    %cst = arith.constant 0.000000e+00 : f32
    %1 = vector.broadcast %cst : f32 to vector<8x512xf32>
    %2 = arith.subf %1, %0 : vector<8x512xf32>
    %c0_1 = arith.constant 0 : index
    %c0_2 = arith.constant 0 : index
    %3 = vector.load %arg1[%c0_1, %c0_2] : memref<8x512xf32, #tpu.memory_space<vmem>>, vector<8x512xf32>
    %c0_3 = arith.constant 0 : index
    %c0_4 = arith.constant 0 : index
    %4 = vector.load %arg2[%c0_3, %c0_4] : memref<8x512xf32, #tpu.memory_space<vmem>>, vector<8x512xf32>
    %5 = arith.subf %3, %4 : vector<8x512xf32>
    %6 = arith.mulf %2, %5 : vector<8x512xf32>
    %cst_5 = arith.constant 5.000000e-01 : f32
    %7 = vector.broadcast %cst_5 : f32 to vector<8x512xf32>
    %8 = arith.addf %6, %7 : vector<8x512xf32>
    %cst_6 = arith.constant 0.000000e+00 : f32
    %9 = vector.broadcast %cst_6 : f32 to vector<8x512xf32>
    %10 = arith.maximumf %9, %8 : vector<8x512xf32>
    %c0_7 = arith.constant 0 : index
    %c0_8 = arith.constant 0 : index
    %11 = vector.load %arg5[%c0_7, %c0_8] : memref<8x512xf32, #tpu.memory_space<vmem>>, vector<8x512xf32>
    tpu.vector_store %arg5[%c0_7, %c0_8], %10 {strides = array<i32>} : memref<8x512xf32, #tpu.memory_space<vmem>>, vector<8x512xf32>,
    %c0_9 = arith.constant 0 : index
    %c0_10 = arith.constant 0 : index
    %12 = vector.load %arg4[%c0_9, %c0_10] : memref<8x512xf32, #tpu.memory_space<vmem>>, vector<8x512xf32>
    %13 = math.exp %12 : vector<8x512xf32>
    %c0_11 = arith.constant 0 : index
    %c0_12 = arith.constant 0 : index
    %14 = vector.load %arg6[%c0_11, %c0_12] : memref<8x512xf32, #tpu.memory_space<vmem>>, vector<8x512xf32>
    tpu.vector_store %arg6[%c0_11, %c0_12], %13 {strides = array<i32>} : memref<8x512xf32, #tpu.memory_space<vmem>>, vector<8x512xf32>,
    return
  }
  func.func @transform_0(%arg0: i32) -> (i32, i32) {
    %c0_i32 = arith.constant 0 : i32
    %c0_i32_0 = arith.constant 0 : i32
    return %arg0, %c0_i32 : i32, i32
  }
  func.func @transform_1(%arg0: i32) -> (i32, i32) {
    %c0_i32 = arith.constant 0 : i32
    %c0_i32_0 = arith.constant 0 : i32
    return %arg0, %c0_i32 : i32, i32
  }
  func.func @transform_2(%arg0: i32) -> (i32, i32) {
    %c0_i32 = arith.constant 0 : i32
    %c0_i32_0 = arith.constant 0 : i32
    return %arg0, %c0_i32 : i32, i32
  }
  func.func @transform_3(%arg0: i32) -> (i32, i32) {
    %c0_i32 = arith.constant 0 : i32
    %c0_i32_0 = arith.constant 0 : i32
    return %arg0, %c0_i32 : i32, i32
  }
  func.func @transform_4(%arg0: i32) -> (i32, i32) {
    %c0_i32 = arith.constant 0 : i32
    %c0_i32_0 = arith.constant 0 : i32
    return %arg0, %c0_i32 : i32, i32
  }
  func.func @transform_5(%arg0: i32) -> (i32, i32) {
    %c0_i32 = arith.constant 0 : i32
    %c0_i32_0 = arith.constant 0 : i32
    return %arg0, %c0_i32 : i32, i32
  }
}

</mosaic_0001>

<bundles_post_ra>
// kernel: _forward_device.1
= control target key start
LH: loop header
LB: loop body
LE: loop exit
PB: predicated region body
PF: predicated region fallthrough
CT: control target
= control target key end

     0   :  { %s189_s0 = inlined_call_operand.vmem [shape: f32[8,512], index: 0, kind: input, shape index: {}]   ;;  %s190_s1 = inlined_call_operand.vmem [shape: f32[8,512], index: 1, kind: input, shape index: {}]   ;;  %s191_s2 = inlined_call_operand.vmem [shape: f32[8,512], index: 2, kind: input, shape index: {}]   ;;  %s192_s3 = inlined_call_operand.vmem [shape: f32[8,512], index: 3, kind: input, shape index: {}]   ;;  %s193_s4 = inlined_call_operand.vmem [shape: f32[8,512], index: 4, kind: output, shape index: {0}]   ;;  %s194_s5 = inlined_call_operand.vmem [shape: f32[8,512], index: 5, kind: output, shape index: {1}]  }
   0x1   :  { %v19_v0 = vld [vmem:[%s191_s2] sm:$0xff]  ;;  %v20_v5 = vld [vmem:[%s191_s2 + $0x8] sm:$0xff]  ;;  %v21_v10 = vld [vmem:[%s191_s2 + $0x10] sm:$0xff] }
   0x2   :  { %v27_v1 = vld [vmem:[%s189_s0] sm:$0xff]  ;;  %v23_v3 = vsub.f32 0.0, %v19_v0  ;;  %v28_v6 = vld [vmem:[%s189_s0 + $0x8] sm:$0xff]  ;;  %v24_v8 = vsub.f32 0.0, %v20_v5  ;;  %v29_v11 = vld [vmem:[%s189_s0 + $0x10] sm:$0xff]  ;;  %v25_v14 = vsub.f32 0.0, %v21_v10 }
   0x3   :  { %v31_v2 = vld [vmem:[%s190_s1] sm:$0xff]  ;;  %v32_v7 = vld [vmem:[%s190_s1 + $0x8] sm:$0xff]  ;;  %v33_v12 = vld [vmem:[%s190_s1 + $0x10] sm:$0xff] }
   0x4   :  { %v35_v4 = vsub.f32 %v27_v1, %v31_v2  ;;  %v36_v9 = vsub.f32 %v28_v6, %v32_v7  ;;  %v37_v15 = vsub.f32 %v29_v11, %v33_v12  ;;  %v22_v16 = vld [vmem:[%s191_s2 + $0x18] sm:$0xff]  ;;  %v55_v22 = vld [vmem:[%s192_s3] sm:$0xff]  ;;  %v56_v23 = vld [vmem:[%s192_s3 + $0x8] sm:$0xff] }
   0x5   :  { %v30_v17 = vld [vmem:[%s189_s0 + $0x18] sm:$0xff]  ;;  %v26_v20 = vsub.f32 0.0, %v22_v16  ;;  %v57_v24 = vld [vmem:[%s192_s3 + $0x10] sm:$0xff]  ;;  %v59_v27 = vmul.f32 1.442695, %v55_v22 }
   0x6   :  { %v39_v13 = vmul.f32 %v35_v4, %v23_v3  ;;  %v34_v18 = vld [vmem:[%s190_s1 + $0x18] sm:$0xff]  ;;  %v40_v19 = vmul.f32 %v36_v9, %v24_v8  ;;  %v41_v26 = vmul.f32 %v37_v15, %v25_v14  ;;  %v61_v28 = vmul.f32 1.442695, %v56_v23 }
   0x7   :  { %v38_v21 = vsub.f32 %v30_v17, %v34_v18  ;;  %v58_v29 = vld [vmem:[%s192_s3 + $0x18] sm:$0xff]  ;;  %v63_v32 = vmul.f32 1.442695, %v57_v24  ;;  %79 = vpow2.f32 %v59_v27 }
   0x8   :  { %v43_v25 = vadd.f32 0.5, %v39_v13  ;;  %v44_v30 = vadd.f32 0.5, %v40_v19  ;;  %v65_v33 = vmul.f32 1.442695, %v58_v29  ;;  %v45_v35 = vadd.f32 0.5, %v41_v26 }
   0x9   :  { %v42_v31 = vmul.f32 %v38_v21, %v26_v20  ;;  %81 = vpow2.f32 %v61_v28 }
   0xa   :  { %v47_v34 = vmax.f32 %v43_v25, 0.0  ;;  %v48_v36 = vmax.f32 %v44_v30, 0.0  ;;  %v49_v38 = vmax.f32 %v45_v35, 0.0  ;;  %83 = vpow2.f32 %v63_v32 }
   0xb   :  { %v46_v37 = vadd.f32 0.5, %v42_v31  ;;  %85 = vpow2.f32 %v65_v33 }
   0xc   :  { %51 = vst [vmem:[%s193_s4] sm:$0xff] %v47_v34  ;;  %52 = vst [vmem:[%s193_s4 + $0x8] sm:$0xff] %v48_v36 }
   0xd   :  { %v50_v39 = vmax.f32 %v46_v37, 0.0  ;;  %53 = vst [vmem:[%s193_s4 + $0x10] sm:$0xff] %v49_v38 }
   0xf   :  { %54 = vst [vmem:[%s193_s4 + $0x18] sm:$0xff] %v50_v39 }
  0x11   :  { %v80_v40 = vpop.eup %79 }
  0x12   :  { %67 = vst [vmem:[%s194_s5] sm:$0xff] %v80_v40 }
  0x13   :  { %v82_v41 = vpop.eup %81 }
  0x14   :  { %v84_v42 = vpop.eup %83  ;;  %68 = vst [vmem:[%s194_s5 + $0x8] sm:$0xff] %v82_v41 }
  0x15   :  { %v86_v43 = vpop.eup %85  ;;  %69 = vst [vmem:[%s194_s5 + $0x10] sm:$0xff] %v84_v42 }
  0x16   :  { %70 = vst [vmem:[%s194_s5 + $0x18] sm:$0xff] %v86_v43 }

</bundles_post_ra>
